<compile_context>
chip_gen: v7x
topology: tpu7x:2x2x1
jax: 0.10.0
libtpu: 0.0.40
codegen_flags: <defaults>
</compile_context>

<pallas_src>
import jax
import jax.numpy as jnp
from jax.experimental import pallas as pl
from jax.experimental.pallas import tpu as pltpu


def _round_up(x, m):
    return ((x + m - 1) // m) * m


def _round_down(x, m):
    return (x // m) * m


def _make_grad_kernel(tile_d, x_resident, lhs_dtype):
    """Two-phase kernel over grid = (phase, D_tiles).

    phase 0: accumulate logits over D tiles; at the last tile compute softmax,
             g = dL/dlogits, dL/db, and a one-off g.T into scratch.
    phase 1: emit one lane-dense [K, tile_d] tile of dL/dW per grid step.
    """

    def kernel(x_ref, w_ref, b_ref, lbl_ref, gw_ref, gb_ref, acc_ref, gT_ref):
        p = pl.program_id(0)          # 0: logits/softmax pass, 1: gW pass
        k = pl.program_id(1)          # D-tile index
        n_d = pl.num_programs(1)

        def x_tile():
            if x_resident:
                start = pl.multiple_of(k * tile_d, tile_d)
                return x_ref[:, pl.ds(start, tile_d)]
            return x_ref[...]

        @pl.when(jnp.logical_and(p == 0, k == 0))
        def _init():
            acc_ref[...] = jnp.zeros_like(acc_ref)

        @pl.when(p == 0)
        def _accumulate_logits():
            # Partial logits for this D tile: contract x[B, tile_d] with
            # W[K, tile_d] over the tile axis; no w.T is materialized.
            acc_ref[...] += jax.lax.dot_general(
                x_tile(), w_ref[...],
                dimension_numbers=(((1,), (1,)), ((), ())),
                preferred_element_type=jnp.float32)

        @pl.when(jnp.logical_and(p == 0, k == n_d - 1))
        def _softmax_and_bias_grad():
            logits = acc_ref[...] + b_ref[...]                       # [B, K]
            m = jnp.max(logits, axis=-1, keepdims=True)
            e = jnp.exp(logits - m)
            denom = jnp.sum(e, axis=-1, keepdims=True)
            prob = e / denom                                         # exact
            classes = jax.lax.broadcasted_iota(jnp.int32, prob.shape, 1)
            onehot = (classes == lbl_ref[...]).astype(jnp.float32)   # [B, K]
            g = (prob - onehot) * (1.0 / prob.shape[0])              # dL/dlogits
            gb_ref[...] = jnp.sum(g, axis=0, keepdims=True)          # dL/db [1,K]
            # One-off transpose so phase 1 is a plain [K,B] @ [B,tile_d] matmul
            # (no per-step transposed-LHS contraction / XLU work).
            gT_ref[...] = jnp.transpose(g, (1, 0))                   # [K, B]

        @pl.when(p == 1)
        def _emit_gw_tile():
            gw_ref[...] = jnp.dot(gT_ref[...].astype(lhs_dtype), x_tile(),
                                  preferred_element_type=jnp.float32)

    return kernel


def gradient_model_weights(image, label, w, b, *, stream_bf16=False):
    """Returns flat concatenated gradients [dW.ravel(), db.ravel()]."""
    B = image.shape[0]
    D = int(image.size // B)
    K = w.shape[0]

    # Glue: flatten NCHW, fix dtypes/shapes.
    x = image.reshape(B, D).astype(jnp.float32)
    w = w.astype(jnp.float32)
    b2d = b.reshape(1, K).astype(jnp.float32)
    lbl2d = label.astype(jnp.int32).reshape(B, 1)

    # ---- generation-aware VMEM / tile sizing ------------------------------
    try:
        vmem_cap = int(pltpu.get_tpu_info().vmem_capacity_bytes)
    except Exception:
        vmem_cap = 64 * 1024 * 1024          # conservative fallback (v7x per-TC)
    vmem_limit = int(vmem_cap * 0.7)         # headroom for Mosaic scratch/sems

    itemsize = 2 if stream_bf16 else 4
    d128 = _round_up(D, 128)

    # Keep x fully VMEM-resident when it is small vs. the budget (removes the
    # duplicate HBM read of x across the two phases).
    x_resident = (2 * itemsize * B * d128) <= (vmem_limit // 4)

    resident_bytes = (2 * itemsize * B * d128) if x_resident else 0
    fixed_bytes = 4 * (2 * B * K + 2 * K + B) + (2 << 20)   # scratch + slack
    # Per D-column working set: double-buffered (x if streamed) + W inputs and
    # the f32 gW output tile.
    per_col = 2 * itemsize * ((0 if x_resident else B) + K) + 2 * 4 * K
    budget = max(vmem_limit - resident_bytes - fixed_bytes, 0)
    tile_d = budget // max(per_col, 1)
    tile_d = min(tile_d, 8192, _round_up(d128, 256))
    tile_d = max(_round_down(tile_d, 128), 128)              # (8,128) lane rule
    d_pad = _round_up(d128, tile_d)
    n_d = d_pad // tile_d

    if d_pad != D:
        # Zero-padded columns contribute 0 to logits, get 0 grad; sliced off below.
        x = jnp.pad(x, ((0, 0), (0, d_pad - D)))
        w = jnp.pad(w, ((0, 0), (0, d_pad - D)))
    if stream_bf16:
        x = x.astype(jnp.bfloat16)
        w = w.astype(jnp.bfloat16)
    lhs_dtype = jnp.bfloat16 if stream_bf16 else jnp.float32

    x_spec = (pl.BlockSpec((B, d_pad), lambda p, k: (0, 0)) if x_resident
              else pl.BlockSpec((B, tile_d), lambda p, k: (0, k)))
    # W: needed only in phase 0; during phase 1 pin it to the LAST phase-0 tile
    # so no extra DMA is issued at the phase boundary.
    w_spec = pl.BlockSpec((K, tile_d),
                          lambda p, k, _n=n_d: (0, k * (1 - p) + (_n - 1) * p))

    x_reads = 1 if x_resident else 2
    flops = 4 * B * K * d_pad                               # fwd + gW matmuls
    bytes_accessed = (x_reads * itemsize * B * d_pad        # x
                      + itemsize * K * d_pad                # W
                      + 4 * K * d_pad                       # gW write
                      + 4 * (B + 2 * K + B * K))            # labels/bias/gb

    gw, gb = pl.pallas_call(
        _make_grad_kernel(tile_d, x_resident, lhs_dtype),
        out_shape=(
            jax.ShapeDtypeStruct((K, d_pad), jnp.float32),
            jax.ShapeDtypeStruct((1, K), jnp.float32),
        ),
        grid_spec=pltpu.PrefetchScalarGridSpec(
            num_scalar_prefetch=0,
            grid=(2, n_d),                                   # (phase, D-tile)
            in_specs=[
                x_spec,
                w_spec,
                # bias and labels: tiny, fetched once and stay resident.
                pl.BlockSpec((1, K), lambda p, k: (0, 0)),
                pl.BlockSpec((B, 1), lambda p, k: (0, 0)),
            ],
            out_specs=(
                # gW: resident on block 0 during phase 0 (never written there),
                # then one lane-dense tile per phase-1 step — each HBM block is
                # written back exactly once with final data.
                pl.BlockSpec((K, tile_d), lambda p, k: (0, k * p)),
                pl.BlockSpec((1, K), lambda p, k: (0, 0)),
            ),
            scratch_shapes=[
                pltpu.VMEM((B, K), jnp.float32),   # logits accumulator
                pltpu.VMEM((K, B), jnp.float32),   # g transposed (one-off)
            ],
        ),
        compiler_params=pltpu.CompilerParams(
            # Phase axis and D-reduction are sequential dependencies.
            dimension_semantics=("arbitrary", "arbitrary"),
            vmem_limit_bytes=vmem_limit,
        ),
        cost_estimate=pl.CostEstimate(
            flops=int(flops), transcendentals=int(B * K),
            bytes_accessed=int(bytes_accessed)),
    )(x, w, b2d, lbl2d)

    # Matches torch.cat([grad.view(-1) for grad in parameters]) with params = [W, b].
    return jnp.concatenate([gw[:, :D].reshape(-1), gb.reshape(-1)])


def _reference_grads(image, label, w, b):
    """Pure-JAX reference: grad of mean cross-entropy w.r.t. (W, b)."""
    B = image.shape[0]
    x = image.reshape(B, -1).astype(jnp.float32)

    def loss_fn(params):
        W, bias = params
        logits = x @ W.T + bias
        logp = jax.nn.log_softmax(logits, axis=-1)
        return -jnp.mean(logp[jnp.arange(B), label])

    gW, gb = jax.grad(loss_fn)((w.astype(jnp.float32), b.astype(jnp.float32)))
    return jnp.concatenate([gW.reshape(-1), gb.reshape(-1)])


if __name__ == "__main__":
    key = jax.random.PRNGKey(0)
    k_img, k_lbl, k_w, k_b = jax.random.split(key, 4)

    # Small shapes consistent with an image-classifier forward.
    B, C, H, W = 2, 4, 16, 16
    D = C * H * W
    K = 16  # number of classes

    image = jax.random.normal(k_img, (B, C, H, W), dtype=jnp.float32)
    label = jax.random.randint(k_lbl, (B,), 0, K, dtype=jnp.int32)
    w = jax.random.normal(k_w, (K, D), dtype=jnp.float32) * 0.02
    b = jax.random.normal(k_b, (K,), dtype=jnp.float32) * 0.02

    grads = gradient_model_weights(image, label, w, b)
    jax.block_until_ready(grads)

    ref = _reference_grads(image, label, w, b)
    assert grads.shape == (K * D + K,)
    # Exact softmax divide restored (perf review); remaining tolerance only
    # covers MXU f32 matmul pass behaviour, not any approximation in-kernel.
    assert jnp.allclose(grads, ref, atol=1e-3, rtol=1e-3)

    print("KERNEL_OK")
</pallas_src>

<mosaic_0001>
module attributes {stable_mosaic.version = 11 : i64} {
  func.func @kernel(%arg0: i32, %arg1: i32, %arg2: memref<2x1024xf32, #tpu.memory_space<vmem>>, %arg3: memref<16x1024xf32, #tpu.memory_space<vmem>>, %arg4: memref<1x16xf32, #tpu.memory_space<vmem>>, %arg5: memref<2x1xi32, #tpu.memory_space<vmem>>, %arg6: memref<16x1024xf32, #tpu.memory_space<vmem>>, %arg7: memref<1x16xf32, #tpu.memory_space<vmem>>, %arg8: memref<2x16xf32, #tpu.memory_space<vmem>>, %arg9: memref<16x2xf32, #tpu.memory_space<vmem>>) attributes {dimension_semantics = [#tpu.dimension_semantics<arbitrary>, #tpu.dimension_semantics<arbitrary>], iteration_bounds = array<i64: 2, 1>, scalar_prefetch = 0 : i64, scratch_operands = 2 : i64, tpu.core_type = #tpu.core_type<tc>, window_params = [{pipeline_mode = #tpu.pipeline_mode<synchronous>, transform_indices = @transform_0, window_bounds = array<i64: 2, 1024>}, {transform_indices = @transform_1, window_bounds = array<i64: 16, 1024>}, {pipeline_mode = #tpu.pipeline_mode<synchronous>, transform_indices = @transform_2, window_bounds = array<i64: 1, 16>}, {pipeline_mode = #tpu.pipeline_mode<synchronous>, transform_indices = @transform_3, window_bounds = array<i64: 2, 1>}, {transform_indices = @transform_4, window_bounds = array<i64: 16, 1024>}, {pipeline_mode = #tpu.pipeline_mode<synchronous>, transform_indices = @transform_5, window_bounds = array<i64: 1, 16>}]} {
    %c0_i32 = arith.constant 0 : i32
    %0 = arith.cmpi eq, %arg0, %c0_i32 : i32
    %c0_i32_0 = arith.constant 0 : i32
    %1 = arith.cmpi eq, %arg1, %c0_i32_0 : i32
    %2 = arith.andi %0, %1 : i1
    %3 = arith.extui %2 : i1 to i32
    %c0_i32_1 = arith.constant 0 : i32
    %4 = arith.cmpi ne, %3, %c0_i32_1 : i32
    scf.if %4 {
      %cst = arith.constant 0.000000e+00 : f32
      %16 = vector.broadcast %cst : f32 to vector<2x16xf32>
      %c0 = arith.constant 0 : index
      %c0_8 = arith.constant 0 : index
      %17 = vector.load %arg8[%c0, %c0_8] : memref<2x16xf32, #tpu.memory_space<vmem>>, vector<2x16xf32>
      tpu.vector_store %arg8[%c0, %c0_8], %16 {strides = array<i32>} : memref<2x16xf32, #tpu.memory_space<vmem>>, vector<2x16xf32>,
    } else {
    }
    %c0_i32_2 = arith.constant 0 : i32
    %5 = arith.cmpi eq, %arg0, %c0_i32_2 : i32
    %6 = arith.extui %5 : i1 to i32
    %c0_i32_3 = arith.constant 0 : i32
    %7 = arith.cmpi ne, %6, %c0_i32_3 : i32
    scf.if %7 {
      %c0 = arith.constant 0 : index
      %c0_8 = arith.constant 0 : index
      %16 = vector.load %arg8[%c0, %c0_8] : memref<2x16xf32, #tpu.memory_space<vmem>>, vector<2x16xf32>
      %c1024_i32 = arith.constant 1024 : i32
      %17 = arith.muli %arg1, %c1024_i32 : i32
      %18 = tpu.assume_multiple %17, 1024 : i32
      %c0_9 = arith.constant 0 : index
      %19 = arith.index_cast %18 : i32 to index
      %20 = vector.load %arg2[%c0_9, %19] : memref<2x1024xf32, #tpu.memory_space<vmem>>, vector<2x1024xf32>
      %c0_10 = arith.constant 0 : index
      %c0_11 = arith.constant 0 : index
      %21 = vector.load %arg3[%c0_10, %c0_11] : memref<16x1024xf32, #tpu.memory_space<vmem>>, vector<16x1024xf32>
      %cst = arith.constant dense<0.000000e+00> : vector<2x16xf32>
      %22 = tpu.matmul %20, %21, %cst {dimension_numbers = #tpu.dot_dimension_numbers<[1], [1], [0], [0], [0, 0, 1, 0], [], []>} : vector<2x1024xf32>, vector<16x1024xf32>, vector<2x16xf32> -> vector<2x16xf32>
      %23 = arith.addf %16, %22 : vector<2x16xf32>
      %c0_12 = arith.constant 0 : index
      %c0_13 = arith.constant 0 : index
      %24 = vector.load %arg8[%c0_12, %c0_13] : memref<2x16xf32, #tpu.memory_space<vmem>>, vector<2x16xf32>
      tpu.vector_store %arg8[%c0_12, %c0_13], %23 {strides = array<i32>} : memref<2x16xf32, #tpu.memory_space<vmem>>, vector<2x16xf32>,
    } else {
    }
    %c0_i32_4 = arith.constant 0 : i32
    %8 = arith.cmpi eq, %arg0, %c0_i32_4 : i32
    %c0_i32_5 = arith.constant 0 : i32
    %9 = arith.cmpi eq, %arg1, %c0_i32_5 : i32
    %10 = arith.andi %8, %9 : i1
    %11 = arith.extui %10 : i1 to i32
    %c0_i32_6 = arith.constant 0 : i32
    %12 = arith.cmpi ne, %11, %c0_i32_6 : i32
    scf.if %12 {
      %c0 = arith.constant 0 : index
      %c0_8 = arith.constant 0 : index
      %16 = vector.load %arg8[%c0, %c0_8] : memref<2x16xf32, #tpu.memory_space<vmem>>, vector<2x16xf32>
      %c0_9 = arith.constant 0 : index
      %c0_10 = arith.constant 0 : index
      %17 = vector.load %arg4[%c0_9, %c0_10] : memref<1x16xf32, #tpu.memory_space<vmem>>, vector<1x16xf32>
      %18 = vector.broadcast %17 : vector<1x16xf32> to vector<2x16xf32>
      %19 = arith.addf %16, %18 : vector<2x16xf32>
      %cst = arith.constant dense<0xFF800000> : vector<2xf32>
      %20 = vector.multi_reduction <maximumf>, %19, %cst [1] : vector<2x16xf32> to vector<2xf32>
      %21 = vector.shape_cast %20 : vector<2xf32> to vector<2x1xf32>
      %22 = vector.broadcast %21 : vector<2x1xf32> to vector<2x16xf32>
      %23 = arith.subf %19, %22 : vector<2x16xf32>
      %24 = math.exp %23 : vector<2x16xf32>
      %cst_11 = arith.constant dense<0.000000e+00> : vector<2xf32>
      %25 = vector.multi_reduction <add>, %24, %cst_11 [1] : vector<2x16xf32> to vector<2xf32>
      %26 = vector.shape_cast %25 : vector<2xf32> to vector<2x1xf32>
      %27 = vector.broadcast %26 : vector<2x1xf32> to vector<2x16xf32>
      %28 = arith.divf %24, %27 : vector<2x16xf32>
      %29 = tpu.iota {dimensions = array<i32: 1>} : vector<2x16xi32>
      %c0_12 = arith.constant 0 : index
      %c0_13 = arith.constant 0 : index
      %30 = vector.load %arg5[%c0_12, %c0_13] : memref<2x1xi32, #tpu.memory_space<vmem>>, vector<2x1xi32>
      %31 = vector.broadcast %30 : vector<2x1xi32> to vector<2x16xi32>
      %32 = arith.cmpi eq, %29, %31 : vector<2x16xi32>
      %33 = arith.extui %32 : vector<2x16xi1> to vector<2x16xi32>
      %34 = arith.sitofp %33 : vector<2x16xi32> to vector<2x16xf32>
      %35 = arith.subf %28, %34 : vector<2x16xf32>
      %cst_14 = arith.constant 5.000000e-01 : f32
      %36 = vector.broadcast %cst_14 : f32 to vector<2x16xf32>
      %37 = arith.mulf %35, %36 : vector<2x16xf32>
      %cst_15 = arith.constant dense<0.000000e+00> : vector<16xf32>
      %38 = vector.multi_reduction <add>, %37, %cst_15 [0] : vector<2x16xf32> to vector<16xf32>
      %39 = vector.shape_cast %38 : vector<16xf32> to vector<1x16xf32>
      %c0_16 = arith.constant 0 : index
      %c0_17 = arith.constant 0 : index
      %40 = vector.load %arg7[%c0_16, %c0_17] : memref<1x16xf32, #tpu.memory_space<vmem>>, vector<1x16xf32>
      tpu.vector_store %arg7[%c0_16, %c0_17], %39 {strides = array<i32>} : memref<1x16xf32, #tpu.memory_space<vmem>>, vector<1x16xf32>,
      %41 = tpu.transpose %37, [1, 0] : vector<2x16xf32> -> vector<16x2xf32>
      %c0_18 = arith.constant 0 : index
      %c0_19 = arith.constant 0 : index
      %42 = vector.load %arg9[%c0_18, %c0_19] : memref<16x2xf32, #tpu.memory_space<vmem>>, vector<16x2xf32>
      tpu.vector_store %arg9[%c0_18, %c0_19], %41 {strides = array<i32>} : memref<16x2xf32, #tpu.memory_space<vmem>>, vector<16x2xf32>,
    } else {
    }
    %c1_i32 = arith.constant 1 : i32
    %13 = arith.cmpi eq, %arg0, %c1_i32 : i32
    %14 = arith.extui %13 : i1 to i32
    %c0_i32_7 = arith.constant 0 : i32
    %15 = arith.cmpi ne, %14, %c0_i32_7 : i32
    scf.if %15 {
      %c0 = arith.constant 0 : index
      %c0_8 = arith.constant 0 : index
      %16 = vector.load %arg9[%c0, %c0_8] : memref<16x2xf32, #tpu.memory_space<vmem>>, vector<16x2xf32>
      %c1024_i32 = arith.constant 1024 : i32
      %17 = arith.muli %arg1, %c1024_i32 : i32
      %18 = tpu.assume_multiple %17, 1024 : i32
      %c0_9 = arith.constant 0 : index
      %19 = arith.index_cast %18 : i32 to index
      %20 = vector.load %arg2[%c0_9, %19] : memref<2x1024xf32, #tpu.memory_space<vmem>>, vector<2x1024xf32>
      %cst = arith.constant dense<0.000000e+00> : vector<16x1024xf32>
      %21 = tpu.matmul %16, %20, %cst {dimension_numbers = #tpu.dot_dimension_numbers<[1], [0], [0], [1], [0, 0, 1, 1], [], []>} : vector<16x2xf32>, vector<2x1024xf32>, vector<16x1024xf32> -> vector<16x1024xf32>
      %c0_10 = arith.constant 0 : index
      %c0_11 = arith.constant 0 : index
      %22 = vector.load %arg6[%c0_10, %c0_11] : memref<16x1024xf32, #tpu.memory_space<vmem>>, vector<16x1024xf32>
      tpu.vector_store %arg6[%c0_10, %c0_11], %21 {strides = array<i32>} : memref<16x1024xf32, #tpu.memory_space<vmem>>, vector<16x1024xf32>,
    } else {
    }
    return
  }
  func.func @transform_0(%arg0: i32, %arg1: i32) -> (i32, i32) {
    %c0_i32 = arith.constant 0 : i32
    %c0_i32_0 = arith.constant 0 : i32
    %c0_i32_1 = arith.constant 0 : i32
    return %c0_i32, %c0_i32_0 : i32, i32
  }
  func.func @transform_1(%arg0: i32, %arg1: i32) -> (i32, i32) {
    %c1_i32 = arith.constant 1 : i32
    %0 = arith.subi %c1_i32, %arg0 : i32
    %1 = arith.muli %arg1, %0 : i32
    %c0_i32 = arith.constant 0 : i32
    %2 = arith.muli %c0_i32, %arg0 : i32
    %3 = arith.addi %1, %2 : i32
    %c0_i32_0 = arith.constant 0 : i32
    %c0_i32_1 = arith.constant 0 : i32
    return %c0_i32_0, %3 : i32, i32
  }
  func.func @transform_2(%arg0: i32, %arg1: i32) -> (i32, i32) {
    %c0_i32 = arith.constant 0 : i32
    %c0_i32_0 = arith.constant 0 : i32
    %c0_i32_1 = arith.constant 0 : i32
    return %c0_i32, %c0_i32_0 : i32, i32
  }
  func.func @transform_3(%arg0: i32, %arg1: i32) -> (i32, i32) {
    %c0_i32 = arith.constant 0 : i32
    %c0_i32_0 = arith.constant 0 : i32
    %c0_i32_1 = arith.constant 0 : i32
    return %c0_i32, %c0_i32_0 : i32, i32
  }
  func.func @transform_4(%arg0: i32, %arg1: i32) -> (i32, i32) {
    %0 = arith.muli %arg1, %arg0 : i32
    %c0_i32 = arith.constant 0 : i32
    %c0_i32_0 = arith.constant 0 : i32
    return %c0_i32, %0 : i32, i32
  }
  func.func @transform_5(%arg0: i32, %arg1: i32) -> (i32, i32) {
    %c0_i32 = arith.constant 0 : i32
    %c0_i32_0 = arith.constant 0 : i32
    %c0_i32_1 = arith.constant 0 : i32
    return %c0_i32, %c0_i32_0 : i32, i32
  }
}

</mosaic_0001>

<bundles_post_ra>
// kernel: tpu_custom_call.1
= control target key start
LH: loop header
LB: loop body
LE: loop exit
PB: predicated region body
PF: predicated region fallthrough
CT: control target
= control target key end

     0   :  { %11 = vsyncpa [#allocation5], 0  ;;  %s1766_s0 = inlined_call_operand.hbm [shape: f32[2,1024], index: 0, kind: input, shape index: {}]   ;;  %s1767_s1 = inlined_call_operand.hbm [shape: f32[16,1024], index: 1, kind: input, shape index: {}]   ;;  %s1768_s2 = inlined_call_operand.vmem [shape: f32[1,16], index: 2, kind: input, shape index: {}]   ;;  %s1769_s3 = inlined_call_operand.vmem [shape: s32[2,1], index: 3, kind: input, shape index: {}]   ;;  %s1770_s4 = inlined_call_operand.hbm [shape: f32[16,1024], index: 4, kind: output, shape index: {0}]   ;;  %s1771_s5 = inlined_call_operand.hbm [shape: f32[1,16], index: 5, kind: output, shape index: {1}]  }
   0x1   :  { %12 = vsyncpa [#allocation8], 0 }
   0x2   :  { %14 = vsyncpa [#allocation8 + $0x1], 0 }
   0x3   :  { %15 = vsyncpa [#allocation6], 0 }
   0x4   :  { %17 = vsyncpa [#allocation6 + $0x1], 0 }
   0x5   :  { %18 = vsyncpa [#allocation11], 0  ;;  %s1582_s18 = smov 0   ;;  %s1584_s19 = smov 0  }
   0x6   :  { %s1586_s20 = smov 0  }
   0x7 LB: > { %s1251_s21 = sadd.s32 4294967295, %s1536_s20   ;;  %s1252_s22 = sadd.s32 4294967294, %s1536_s20   ;;  %s1536_s20 = sphi %s1586_s20, %s24_s20   ;;  %s1532_s19 = sphi %s1584_s19, %s1786_s19   ;;  %s1528_s18 = sphi %s1582_s18, %s1785_s18  }
   0x8   : > { %s36_s23 = sadd.s32 1, %s1532_s19  ;;  %p1253_p0 = scmp.ge.s32.totalorder %s1536_s20, 1 }
   0x9   : > { %p38_p1 = scmp.ge.s32.totalorder %s36_s23, 2  ;;  %p183_p2 = scmp.lt.s32.totalorder %s1536_s20, 3 }
   0xa   : > { %p1604_p3 = scmp.eq.s32.totalorder %s1251_s21, 0  ;;  %s1538_s26 = smov [#allocation4]  }
   0xb   : > { %s1788_s23 = smov (%p38_p1, %s36_s23), 0  ;;  %p1610_p4 = pnand %p1253_p0, %p183_p2 }
   0xc   : > { %s1775_s24 = scalar_select %p1604_p3, 1, 0 }
   0xd   : > { %s1776_s25 = scalar_select %p1610_p4, 1, 0 }
   0xe   : > { %s196_s27 = sshll.u32 %s1538_s26, 4  ;;  %p1320_p6 = pneg %p1610_p4  ;;  %s197_s27 = int_to_ptr.vmem [resolvable:$true] %s196_s27 }
   0xf   : > { %s1539_s29 = smov [#allocation7]   ;;  %s1390_s8 = scalar_lea.hbm %s1766_s0, 256 }
  0x10   : > { %p1620_p8 = pnand %p1604_p3, %p1320_p6  ;;  %s226_s30 = sshll.u32 %s1539_s29, 4  ;;  %s227_s30 = int_to_ptr.vmem [resolvable:$true] %s226_s30 }
  0x11   : > { %p1391_p10 = scmp.ne.s32.totalorder %s1766_s0, %s1390_s8  ;;  %p1397_p0 = scmp.lt.u32.totalorder %s1390_s8, %s1766_s0 }
  0x12   : > { %p1392_p11 = pneg %p1620_p8 }
  0x14   : > { %p1393_p12 = pnand %p1392_p11, %p1391_p10 }
  0x16   : > { %p1394_p13 = pneg %p1393_p12 }
  0x18   : > { %p1399_p1 = pnand %p1397_p0, %p1394_p13 }
  0x1a   : > { %1402 = shalt.err (!%p1399_p1)
}
  0x1b   : > { %s1403_s13 = scalar_lea.vmem %s197_s27, 256  ;;  %p1411_p9 = scmp.lt.s32.totalorder %s197_s27, %s197_s27 }
  0x1c   : > { %p1404_p2 = scmp.ne.s32.totalorder %s197_s27, %s1403_s13  ;;  %p1412_p7 = scmp.lt.s32.totalorder %s1403_s13, %s1403_s13 }
  0x1e   : > { %p1406_p6 = pnand %p1404_p2, %p1392_p11  ;;  %p1413_p3 = por %p1412_p7, %p1411_p9 }
  0x20   : > { %p1407_p5 = pneg %p1406_p6 }
  0x22   : > { %p1414_p4 = pnand %p1413_p3, %p1407_p5 }
  0x24   : > { %1417 = shalt.err (!%p1414_p4)
}
  0x25   : > { %1323 = dma.hbm_to_vmem [thread:$0]  (!%p1620_p8), %s1766_s0, 256, %s197_s27, [#allocation5]  }
  0x26   : > { %p1778_p10 = scmp.lt.s32.totalorder %s1536_s20, 2  ;;  %p1779_p12 = scmp.eq.s32.totalorder %s1536_s20, 0 }
  0x27   : > { %s1418_s29 = scalar_lea.hbm %s1767_s1, 2048 }
  0x28   : > { %p1645_p13 = pnand %p1779_p12, %p1778_p10  ;;  %p1419_p3 = scmp.ne.s32.totalorder %s1767_s1, %s1418_s29 }
  0x29   : > { %p1425_p8 = scmp.lt.u32.totalorder %s1418_s29, %s1767_s1 }
  0x2a   : > { %p1420_p4 = pneg %p1645_p13 }
  0x2c   : > { %p1421_p5 = pnand %p1420_p4, %p1419_p3 }
  0x2e   : > { %p1422_p7 = pneg %p1421_p5 }
  0x30   : > { %p1427_p9 = pnand %p1425_p8, %p1422_p7 }
  0x32   : > { %1430 = shalt.err (!%p1427_p9)
}
  0x33   : > { %s1431_s8 = scalar_lea.vmem %s227_s30, 2048  ;;  %s1438_s9 = scalar_lea.vmem %s227_s30, 4096 }
  0x34   : > { %p1432_p11 = scmp.ne.s32.totalorder %s227_s30, %s1431_s8  ;;  %p1439_p2 = scmp.lt.s32.totalorder %s227_s30, %s227_s30 }
  0x35   : > { %p1440_p6 = scmp.lt.s32.totalorder %s1438_s9, %s1431_s8 }
  0x36   : > { %p1434_p0 = pnand %p1432_p11, %p1420_p4 }
  0x37   : > { %p1441_p10 = por %p1440_p6, %p1439_p2 }
  0x38   : > { %p1435_p1 = pneg %p1434_p0 }
  0x3a   : > { %p1442_p12 = pnand %p1441_p10, %p1435_p1 }
  0x3c   : > { %1445 = shalt.err (!%p1442_p12)
}
  0x3d   : > { %s1540_s10 = smov 1024   ;;  %s1541_s11 = smov 64  }
  0x3e   : > { %1327 = dma.hbm_to_vmem [thread:$0]  (!%p1645_p13), %s1767_s1, 2048, %s227_s30, [#allocation8], %s1540_s10, %s1540_s10, %s1541_s11  }
  0x3f   : > { %p1781_p3 = scmp.ne.s32.totalorder %s1776_s25, 0 }
  0x40   : > { %p1782_p4 = scmp.ne.s32.totalorder (!%p1781_p3), %s1775_s24, 0 }
  0x41   : > { %238 = sbr.rel (%p1781_p3) target bundleno = 1074 (0x432), region = 36 }
  0x48   : > { %1511 = dma.done.wait (%p1782_p4), [#allocation5], 256  }
  0x49   : > { %1513 = vsyncadd (%p1782_p4), [#allocation5], 4294967040 }
  0x4a   : > { %1515 = dma.done.wait (%p1782_p4), [#allocation8], 2048  }
  0x4b   : > { %1517 = vsyncadd (%p1782_p4), [#allocation8], 4294965248  ;;  %p280_p5 = scmp.eq.s32.totalorder %s1528_s18, 0 }
  0x4c   : > { %vm286_vm0 = vcmask (%p280_p5), 123904   ;;  %v1542_v0 = vmov (%p280_p5), 0.0  }
  0x4d   : > { %285 = sbr.rel (!%p280_p5) target bundleno = 84 (0x54), region = 48  ;;  %287 = vst.msk [vmem:[#allocation2] sm:$0x3] (%p280_p5), %vm286_vm0, %v1542_v0 }
  0x54 PF: > { %p1261_p13 = scmp.ne.s32.totalorder %s1528_s18, 0 }
  0x55   : > { %v300_v1 = vld [vmem:[#allocation7 + $0x8] sm:$0xff] (!%p1261_p13)  ;;  %v299_v3 = vld [vmem:[#allocation7] sm:$0xff] (!%p1261_p13)  ;;  %v321_v4 = vlaneseq (!%p1261_p13)  ;;  %v302_v7 = vld [vmem:[#allocation7 + $0x18] sm:$0xff] (!%p1261_p13)  ;;  %v1543_v9 = vmov (!%p1261_p13), 1983009808   ;;  %vm640_vm1 = vcmask (!%p1261_p13), 123904  }
  0x56   : > { %290 = sbr.rel (%p1261_p13) target bundleno = 324 (0x144), region = 52  ;;  %v308_v2 = vld [vmem:[#allocation7 + $0x48] sm:$0xff] (!%p1261_p13)  ;;  %v307_v6 = vld [vmem:[#allocation7 + $0x40] sm:$0xff] (!%p1261_p13)  ;;  %v310_v8 = vld [vmem:[#allocation7 + $0x58] sm:$0xff] (!%p1261_p13)  ;;  %v319_v10 = vunpack.c.l.s4 (!%p1261_p13), %v1543_v9 }
  0x57   : > { %v1288_v5 = vpack.c.bf16 (!%p1261_p13), %v308_v2, %v300_v1  ;;  %v1290_v11 = vpack.c.bf16 (!%p1261_p13), %v307_v6, %v299_v3  ;;  %v1292_v12 = vpack.c.bf16 (!%p1261_p13), %v310_v8, %v302_v7  ;;  %v301_v13 = vld [vmem:[#allocation7 + $0x10] sm:$0xff] (!%p1261_p13)  ;;  %v322_v16 = vshrl.u32 (!%p1261_p13), %v321_v4, 7  ;;  %v304_v20 = vld [vmem:[#allocation7 + $0x28] sm:$0xff] (!%p1261_p13)  ;;  %v306_v23 = vld [vmem:[#allocation7 + $0x38] sm:$0xff] (!%p1261_p13) }
  0x58   : > { %v309_v14 = vld [vmem:[#allocation7 + $0x50] sm:$0xff] (!%p1261_p13)  ;;  %v320_v18 = vunpack.c.0.s8 (!%p1261_p13), %v319_v10  ;;  %v312_v21 = vld [vmem:[#allocation7 + $0x68] sm:$0xff] (!%p1261_p13)  ;;  %v314_v24 = vld [vmem:[#allocation7 + $0x78] sm:$0xff] (!%p1261_p13) }
  0x59   : > { %v297_v15 = vld [vmem:[#allocation4] sm:$0xff] (!%p1261_p13)  ;;  %1289 = vmatprep.subr.bf16.mxu0 (!%p1261_p13), %v1288_v5  ;;  %v1294_v17 = vpack.c.bf16 (!%p1261_p13), %v309_v14, %v301_v13  ;;  %1293 = vmatprep.subr.bf16.mxu1 (!%p1261_p13), %v1292_v12  ;;  %v1296_v22 = vpack.c.bf16 (!%p1261_p13), %v312_v21, %v304_v20  ;;  %v303_v26 = vld [vmem:[#allocation7 + $0x20] sm:$0xff] (!%p1261_p13)  ;;  %v1300_v27 = vpack.c.bf16 (!%p1261_p13), %v314_v24, %v306_v23  ;;  %v298_v28 = vld [vmem:[#allocation4 + $0x8] sm:$0xff] (!%p1261_p13) }
  0x5a   : > { %v317_v19 = vcombine.high (!%p1261_p13), %v297_v15, %v297_v15  ;;  %1291 = vmatpush1.bf16.xpose.msra.mxu0 (!%p1261_p13), %v1290_v11  ;;  %v323_v25 = vsub.s32 (!%p1261_p13), %v320_v18, %v322_v16  ;;  %v311_v29 = vld [vmem:[#allocation7 + $0x60] sm:$0xff] (!%p1261_p13)  ;;  %v305_v30 = vld [vmem:[#allocation7 + $0x30] sm:$0xff] (!%p1261_p13)  ;;  %v334_v32 = vcombine.high (!%p1261_p13), %v298_v28, %v298_v28  ;;  %v291_v53 = vld [vmem:[#allocation2] sm:$0x3] (!%p1261_p13) }
  0x5b   : > { %1295 = vmatpush1.bf16.xpose.msra.mxu1 (!%p1261_p13), %v1294_v17  ;;  %1297 = vmatprep.subr.bf16.mxu0 (!%p1261_p13), %v1296_v22  ;;  %v313_v31 = vld [vmem:[#allocation7 + $0x70] sm:$0xff] (!%p1261_p13)  ;;  %v1298_v39 = vpack.c.bf16 (!%p1261_p13), %v311_v29, %v303_v26 }
  0x5c   : > { %v324_v33 = vrot.slane (!%p1261_p13), %v297_v15, %v323_v25  ;;  %v331_v34 = vrot.slane (!%p1261_p13), %v317_v19, %v323_v25  ;;  %1301 = vmatprep.subr.bf16.mxu1 (!%p1261_p13), %v1300_v27  ;;  %v341_v35 = vrot.slane (!%p1261_p13), %v298_v28, %v323_v25  ;;  %v348_v36 = vrot.slane (!%p1261_p13), %v334_v32, %v323_v25 }
  0x5d   : > { %v1302_v40 = vpack.c.bf16 %v313_v31, %v305_v30 }
  0x5e   : > { %v332_v37 = vcombine.high %v324_v33, %v324_v33  ;;  %v333_v38 = vcombine.high %v331_v34, %v331_v34  ;;  %v349_v41 = vcombine.high %v341_v35, %v341_v35  ;;  %v350_v42 = vcombine.high %v348_v36, %v348_v36 }
  0x60   : > { %423 = vmatprep.mubr.f32.mxu0 %v332_v37  ;;  %493 = vmatprep.mubr.f32.mxu1 %v333_v38 }
  0x61   : > { %424 = vmatmul.mubr.f32.vlgmr.msra.gmra.mrb[0].mxu0 %v324_v33 }
  0x62   : > { %494 = vmatmul.mubr.f32.vlgmr.msra.gmra.mrb[0].mxu1 %v331_v34  ;;  %1299 = vmatpush1.bf16.xpose.msra.mxu0 %v1298_v39 }
  0x63   : > { %1303 = vmatpush1.bf16.xpose.msra.mxu1 %v1302_v40  ;;  %563 = vmatprep.mubr.f32.mxu0 %v349_v41 }
  0x64   : > { %633 = vmatprep.mubr.f32.mxu1 %v350_v42 }
  0x69   : > { %564 = vmatmul.mubr.f32.vlgmr.msra.gmra.mrb[2].mxu0 %v341_v35 }
  0x6a   : > { %634 = vmatmul.mubr.f32.vlgmr.msra.gmra.mrb[2].mxu1 %v348_v36 }
 0x134   : > { %v425_v43 = vpop.f32.mrb[0].mxu0 }
 0x135   : > { %v495_v44 = vpop.f32.mrb[0].mxu1  ;;  %v427_v46 = vpop.f32.mrb[1].mxu0 }
 0x136   : > { %v496_v45 = vadd.f32 %v495_v44, %v425_v43  ;;  %v497_v47 = vpop.f32.mrb[1].mxu1 }
 0x13c   : > { %v565_v48 = vpop.f32.mrb[2].mxu0 }
 0x13d   : > { %v635_v49 = vpop.f32.mrb[2].mxu1  ;;  %v566_v50 = vadd.f32 %v565_v48, %v496_v45  ;;  %v567_v51 = vpop.f32.mrb[3].mxu0 }
 0x13e   : > { %v637_v52 = vpop.f32.mrb[3].mxu1 }
 0x13f   : > { %v636_v54 = vadd.f32 %v635_v49, %v566_v50 }
 0x141   : > { %v639_v55 = vadd.f32 %v636_v54, %v291_v53 }
 0x143   : > { %641 = vst.msk [vmem:[#allocation2] sm:$0x3] %vm640_vm1, %v639_v55 }
 0x144 PF: > { %643 = sbr.rel (!%p280_p5) target bundleno = 785 (0x311), region = 56  ;;  %v1262_v57 = vld [vmem:[%s1768_s2] ss:$0 sm:$0xff] (%p280_p5)  ;;  %vm653_vm2 = vcmask (%p280_p5), 123904   ;;  %v1544_v61 = vmov (%p280_p5), 0   ;;  %v665_v4 = vlaneseq (%p280_p5)  ;;  %v1545_v8 = vmov (%p280_p5), 0.0  }
 0x145   : > { %v667_v60 = vld [vmem:[%s1769_s3] sm:$0x3] (%p280_p5)  ;;  %1382 = vset.pattern.permute.xlu1 (%p280_p5), %v1544_v61  ;;  %1383 = vset.pattern.permute.xlu0 (%p280_p5), %v1544_v61  ;;  %vm683_vm4 = vcmask (%p280_p5), 122880   ;;  %vm717_vm5 = vcmask (%p280_p5), 15360  }
 0x146   : > { %669 = vperm.xlu1 (%p280_p5), %1382, %v667_v60   ;;  %v666_v5 = vand.u32 (%p280_p5), 127, %v665_v4 }
 0x14a   : > { %v644_v56 = vld [vmem:[#allocation2] sm:$0x3] (%p280_p5) }
 0x14b   : > { %v652_v58 = vadd.f32 %v1262_v57, %v644_v56 }
 0x14d   : > { %v654_v59 = vsel %vm653_vm2, %v652_v58, -inf }
 0x14e   : > { %655 = vmax.xlane.f32.xlu0 %v654_v59 }
 0x1c5   : > { %v670_v6 = vpop.permute.xlu1 %669 }
 0x1c6   : > { %vm671_vm3 = vcmp.eq.s32.totalorder %v666_v5, %v670_v6 }
 0x1c7   : > { %v1263_v9 = vsel %vm671_vm3, 1.0, %v1545_v8 }
 0x1db   : > { %v656_v62 = vpop.xlane.xlu0 %655 }
 0x1dc   : > { %v657_v63 = vsub.f32 %v652_v58, %v656_v62 }
 0x1de   : > { %v658_v0 = vmul.f32 1.442695, %v657_v63 }
 0x1e0   : > { %1384 = vpow2.f32 %v658_v0 }
 0x1ea   : > { %v1385_v1 = vpop.eup %1384 }
 0x1eb   : > { %v660_v2 = vsel %vm653_vm2, %v1385_v1, 0.0 }
 0x1ec   : > { %661 = vadd.xlane.f32.xlu0 %v660_v2 }
 0x279   : > { %v662_v3 = vpop.xlane.xlu0 %661 }
 0x27a   : > { %1386 = vrcp.f32 %v662_v3 }
 0x284   : > { %v1387_v7 = vpop.eup %1386 }
 0x285   : > { %v664_v10 = vmul.f32 %v1387_v7, %v1385_v1 }
 0x287   : > { %v674_v11 = vsub.f32 %v664_v10, %v1263_v9 }
 0x289   : > { %v675_v12 = vmul.f32 0.5, %v674_v11 }
 0x28b   : > { %v676_v13 = vsel %vm653_vm2, %v675_v12, 0.0  ;;  %685 = vxpose.xlu1.b32.start.end [1/1] (short) (narrow) %v675_v12, 16 }
 0x28c   : > { %v677_v14 = vrot.slane %v676_v13, 4 }
 0x28e   : > { %v678_v15 = vadd.f32 %v677_v14, %v676_v13 }
 0x290   : > { %v679_v16 = vrot.slane %v678_v15, 2 }
 0x292   : > { %v680_v17 = vadd.f32 %v679_v16, %v678_v15 }
 0x294   : > { %v681_v18 = vrot.slane %v680_v17, 1 }
 0x296   : > { %v682_v19 = vadd.f32 %v681_v18, %v680_v17 }
 0x298   : > { %684 = vst.msk [vmem:[#allocation10] sm:$0x1] %vm683_vm4, %v682_v19 }
 0x30b   : > { %v701_v20 = vpop.trf.xlu1 }
 0x30c   : > { %718 = vst.msk [vmem:[#allocation3] sm:$0xff] %vm717_vm5, %v701_v20 }
 0x30f   : > { %v702_v21 = vpop.trf.xlu1 }
 0x310   : > { %719 = vst.msk [vmem:[#allocation3 + $0x8] sm:$0xff] %vm717_vm5, %v702_v21 }
 0x311 PF: > { %p1264_p7 = scmp.ne.s32.totalorder %s1528_s18, 1 }
 0x312   : > { %v731_v22 = vld [vmem:[#allocation4] sm:$0xff] (!%p1264_p7)  ;;  %v739_v23 = vlaneseq (!%p1264_p7)  ;;  %v1546_v24 = vmov (!%p1264_p7), 1983009808   ;;  %v1547_v26 = vmov (!%p1264_p7), 0.0   ;;  %v732_v27 = vld [vmem:[#allocation4 + $0x8] sm:$0xff] (!%p1264_p7)  ;;  %vm776_vm6 = vcmask (!%p1264_p7), 1041408  }
 0x313   : > { %723 = sbr.rel (%p1264_p7) target bundleno = 1025 (0x401), region = 60  ;;  %v737_v25 = vunpack.c.l.s4 (!%p1264_p7), %v1546_v24  ;;  %857 = vmatprep.mubr.f32.mxu0 (!%p1264_p7), %v1547_v26  ;;  %934 = vmatprep.mubr.f32.mxu1 (!%p1264_p7), %v1547_v26  ;;  %v735_v30 = vcombine.high (!%p1264_p7), %v731_v22, %v731_v22  ;;  %v752_v31 = vcombine.high (!%p1264_p7), %v732_v27, %v732_v27  ;;  %v724_v39 = vld [vmem:[#allocation3] sm:$0xff] (!%p1264_p7)  ;;  %vm769_vm7 = vcmask (!%p1264_p7), 15360  }
 0x314   : > { %v740_v28 = vshrl.u32 (!%p1264_p7), %v739_v23, 7 }
 0x315   : > { %v738_v29 = vunpack.c.0.s8 (!%p1264_p7), %v737_v25 }
 0x317   : > { %v741_v32 = vsub.s32 (!%p1264_p7), %v738_v29, %v740_v28  ;;  %v725_v42 = vld [vmem:[#allocation3 + $0x8] sm:$0xff] (!%p1264_p7) }
 0x319   : > { %v742_v33 = vrot.slane (!%p1264_p7), %v731_v22, %v741_v32  ;;  %v749_v34 = vrot.slane (!%p1264_p7), %v735_v30, %v741_v32  ;;  %v759_v35 = vrot.slane (!%p1264_p7), %v732_v27, %v741_v32  ;;  %v766_v36 = vrot.slane (!%p1264_p7), %v752_v31, %v741_v32 }
 0x31b   : > { %v750_v37 = vcombine.high %v742_v33, %v742_v33  ;;  %v751_v38 = vcombine.high %v749_v34, %v749_v34  ;;  %v767_v40 = vcombine.high %v759_v35, %v759_v35  ;;  %v768_v41 = vcombine.high %v766_v36, %v766_v36 }
 0x31d   : > { %1265 = vmatprep.subr.msk.mxu0 %vm776_vm6, %v750_v37  ;;  %1269 = vmatprep.subr.msk.mxu1 %vm776_vm6, %v751_v38 }
 0x31e   : > { %1266 = vmatpush1.msk.msra.mxu0 %vm776_vm6, %v742_v33  ;;  %1270 = vmatpush1.msk.msra.mxu1 %vm776_vm6, %v749_v34 }
 0x31f   : > { %1267 = vmatmul.mubr.msk.f32.vlgmr.msra.gmra.mrb[0].mxu0 %vm769_vm7, %v724_v39  ;;  %1271 = vmatmul.mubr.msk.f32.vlgmr.msra.gmra.mrb[0].mxu1 %vm769_vm7, %v724_v39 }
 0x320   : > { %1273 = vmatprep.subr.msk.mxu0 %vm776_vm6, %v767_v40  ;;  %1277 = vmatprep.subr.msk.mxu1 %vm776_vm6, %v768_v41 }
 0x321   : > { %1274 = vmatpush1.msk.msra.mxu0 %vm776_vm6, %v759_v35  ;;  %1278 = vmatpush1.msk.msra.mxu1 %vm776_vm6, %v766_v36 }
 0x322   : > { %863 = vmatprep.mubr.f32.mxu0 %v1547_v26  ;;  %940 = vmatprep.mubr.f32.mxu1 %v1547_v26 }
 0x323   : > { %1268 = vmatmul.mubr.msk.f32.gmra.mrb[2].mxu0 %vm769_vm7, %v725_v42  ;;  %1272 = vmatmul.mubr.msk.f32.gmra.mrb[2].mxu1 %vm769_vm7, %v725_v42 }
 0x324   : > { %1011 = vmatprep.mubr.f32.mxu0 %v1547_v26  ;;  %1088 = vmatprep.mubr.f32.mxu1 %v1547_v26 }
 0x327   : > { %1275 = vmatmul.mubr.msk.f32.vlgmr.msra.gmra.mrb[4].mxu0 %vm769_vm7, %v724_v39  ;;  %1279 = vmatmul.mubr.msk.f32.vlgmr.msra.gmra.mrb[4].mxu1 %vm769_vm7, %v724_v39 }
 0x328   : > { %1017 = vmatprep.mubr.f32.mxu0 %v1547_v26  ;;  %1094 = vmatprep.mubr.f32.mxu1 %v1547_v26 }
 0x32b   : > { %1276 = vmatmul.mubr.msk.f32.gmra.mrb[6].mxu0 %vm769_vm7, %v725_v42  ;;  %1280 = vmatmul.mubr.msk.f32.gmra.mrb[6].mxu1 %vm769_vm7, %v725_v42 }
 0x3f2   : > { %v859_v43 = vpop.f32.mrb[0].mxu0  ;;  %v936_v44 = vpop.f32.mrb[0].mxu1 }
 0x3f3   : > { %1101 = vst [vmem:[#allocation9] sm:$0xff] %v859_v43  ;;  %1103 = vst [vmem:[#allocation9 + $0x10] sm:$0xff] %v936_v44  ;;  %v861_v45 = vpop.f32.mrb[1].mxu0  ;;  %v938_v46 = vpop.f32.mrb[1].mxu1 }
 0x3f4   : > { %1102 = vst [vmem:[#allocation9 + $0x8] sm:$0xff] %v861_v45  ;;  %1104 = vst [vmem:[#allocation9 + $0x18] sm:$0xff] %v938_v46 }
 0x3f6   : > { %v865_v47 = vpop.f32.mrb[2].mxu0  ;;  %v942_v48 = vpop.f32.mrb[2].mxu1 }
 0x3f7   : > { %1109 = vst [vmem:[#allocation9 + $0x40] sm:$0xff] %v865_v47  ;;  %1111 = vst [vmem:[#allocation9 + $0x50] sm:$0xff] %v942_v48  ;;  %v867_v49 = vpop.f32.mrb[3].mxu0  ;;  %v944_v50 = vpop.f32.mrb[3].mxu1 }
 0x3f8   : > { %1110 = vst [vmem:[#allocation9 + $0x48] sm:$0xff] %v867_v49  ;;  %1112 = vst [vmem:[#allocation9 + $0x58] sm:$0xff] %v944_v50 }
 0x3fa   : > { %v1013_v51 = vpop.f32.mrb[4].mxu0  ;;  %v1090_v52 = vpop.f32.mrb[4].mxu1 }
 0x3fb   : > { %1105 = vst [vmem:[#allocation9 + $0x20] sm:$0xff] %v1013_v51  ;;  %1107 = vst [vmem:[#allocation9 + $0x30] sm:$0xff] %v1090_v52  ;;  %v1015_v53 = vpop.f32.mrb[5].mxu0  ;;  %v1092_v54 = vpop.f32.mrb[5].mxu1 }
 0x3fc   : > { %1106 = vst [vmem:[#allocation9 + $0x28] sm:$0xff] %v1015_v53  ;;  %1108 = vst [vmem:[#allocation9 + $0x38] sm:$0xff] %v1092_v54 }
 0x3fe   : > { %v1019_v55 = vpop.f32.mrb[6].mxu0  ;;  %v1096_v56 = vpop.f32.mrb[6].mxu1 }
 0x3ff   : > { %1113 = vst [vmem:[#allocation9 + $0x60] sm:$0xff] %v1019_v55  ;;  %1115 = vst [vmem:[#allocation9 + $0x70] sm:$0xff] %v1096_v56  ;;  %v1021_v57 = vpop.f32.mrb[7].mxu0  ;;  %v1098_v58 = vpop.f32.mrb[7].mxu1 }
 0x400   : > { %1114 = vst [vmem:[#allocation9 + $0x68] sm:$0xff] %v1021_v57  ;;  %1116 = vst [vmem:[#allocation9 + $0x78] sm:$0xff] %v1098_v58 }
 0x401 PF: > { %p1709_p8 = scmp.eq.s32.totalorder %s1251_s21, 1  ;;  %s1548_s15 = smov [#allocation9]  }
 0x402   : > { %s1132_s16 = sshll.u32 %s1548_s15, 4  ;;  %s1133_s16 = int_to_ptr.vmem [resolvable:$true] %s1132_s16 }
 0x403   : > { %s1446_s17 = scalar_lea.vmem %s1133_s16, 2048  ;;  %s1452_s26 = scalar_lea.vmem %s1133_s16, 4096 }
 0x404   : > { %p1447_p9 = scmp.ne.s32.totalorder %s1133_s16, %s1446_s17  ;;  %p1453_p1 = scmp.lt.s32.totalorder %s1133_s16, %s1133_s16 }
 0x405   : > { %p1454_p2 = scmp.lt.s32.totalorder %s1452_s26, %s1446_s17 }
 0x406   : > { %p1448_p11 = pnand %p1447_p9, %p1709_p8 }
 0x407   : > { %p1455_p6 = por %p1454_p2, %p1453_p1 }
 0x408   : > { %p1449_p0 = pneg %p1448_p11 }
 0x40a   : > { %p1456_p10 = pnand %p1455_p6, %p1449_p0 }
 0x40c   : > { %1459 = shalt.err (!%p1456_p10)
}
 0x40d   : > { %s1460_s6 = scalar_lea.hbm %s1770_s4, 2048 }
 0x40e   : > { %p1461_p12 = scmp.ne.s32.totalorder %s1770_s4, %s1460_s6  ;;  %p1466_p5 = scmp.lt.u32.totalorder %s1460_s6, %s1770_s4 }
 0x410   : > { %p1462_p3 = pnand %p1461_p12, %p1709_p8 }
 0x412   : > { %p1463_p4 = pneg %p1462_p3 }
 0x414   : > { %p1468_p13 = pnand %p1466_p5, %p1463_p4 }
 0x416   : > { %1471 = shalt.err (!%p1468_p13)
}
 0x417   : > { %s1549_s9 = smov 1024   ;;  %s1550_s10 = smov 64  }
 0x418   : > { %1313 = dma.vmem_to_hbm [thread:$0]  (%p1709_p8), %s1133_s16, 2048, %s1770_s4, [#allocation6], %s1549_s9, %s1549_s9, %s1550_s10  }
 0x419   : > { %s1551_s13 = smov [#allocation10]  }
 0x41a   : > { %s1146_s24 = sshll.u32 %s1551_s13, 4  ;;  %s1147_s24 = int_to_ptr.vmem [resolvable:$true] %s1146_s24 }
 0x41b   : > { %s1472_s25 = scalar_lea.vmem %s1147_s24, 16  ;;  %s1478_s30 = scalar_lea.vmem %s1147_s24, 32 }
 0x41c   : > { %p1473_p7 = scmp.ne.s32.totalorder %s1147_s24, %s1472_s25  ;;  %p1479_p0 = scmp.lt.s32.totalorder %s1147_s24, %s1147_s24 }
 0x41d   : > { %p1480_p1 = scmp.lt.s32.totalorder %s1478_s30, %s1472_s25 }
 0x41e   : > { %p1474_p9 = pnand %p1473_p7, %p1709_p8 }
 0x41f   : > { %p1481_p2 = por %p1480_p1, %p1479_p0 }
 0x420   : > { %p1475_p11 = pneg %p1474_p9 }
 0x422   : > { %p1482_p6 = pnand %p1481_p2, %p1475_p11 }
 0x424   : > { %1485 = shalt.err (!%p1482_p6)
}
 0x425   : > { %s1486_s17 = scalar_lea.hbm %s1771_s5, 16 }
 0x426   : > { %p1487_p10 = scmp.ne.s32.totalorder %s1771_s5, %s1486_s17  ;;  %p1492_p4 = scmp.lt.u32.totalorder %s1486_s17, %s1771_s5 }
 0x428   : > { %p1488_p12 = pnand %p1487_p10, %p1709_p8 }
 0x42a   : > { %p1489_p3 = pneg %p1488_p12 }
 0x42c   : > { %p1494_p5 = pnand %p1492_p4, %p1489_p3 }
 0x42e   : > { %1497 = shalt.err (!%p1494_p5)
}
 0x42f   : > { %1315 = dma.vmem_to_hbm [thread:$0]  (%p1709_p8), %s1147_s24, 16, %s1771_s5, [#allocation11]  }
 0x430   : > { %1519 = dma.done.wait (%p1709_p8), [#allocation11], 16  }
 0x431   : > { %1521 = vsyncadd (%p1709_p8), [#allocation11], 4294967280 }
 0x432 PF: > { %p1341_p13 = scmp.eq.s32.totalorder %s1252_s22, 1  ;;  %p1784_p7 = scmp.ge.s32.totalorder %s1536_s20, 2 }
 0x434   : > { %p1329_p9 = pnand %p1341_p13, %p1784_p7 }
 0x436   : > { %1523 = dma.done.wait (!%p1329_p9), [#allocation6], 2048  }
 0x437   : > { %1525 = vsyncadd (!%p1329_p9), [#allocation6], 4294965248  ;;  %s24_s20 = sadd.s32 1, %s1536_s20   ;;  %s1785_s18 = smov %s1532_s19 }
 0x438   : > { %p21_p11 = scmp.ge.s32.totalorder %s24_s20, 4   ;;  %s1786_s19 = smov %s1788_s23 }
 0x43a   :  { %23 = sbr.rel (!%p21_p11) target bundleno = 7 (0x7), region = 112 }
 0x441   :  { %1168 = vsyncpa [#allocation5], 1 }
 0x442   :  { %1170 = vsyncpa [#allocation5 + $0x1], 1 }
 0x443   :  { %1171 = vsyncpa [#allocation8], 1 }
 0x444   :  { %1173 = vsyncpa [#allocation8 + $0x1], 1 }
 0x445   :  { %1174 = vsyncpa [#allocation6], 1 }
 0x446   :  { %1176 = vsyncpa [#allocation6 + $0x1], 1 }
 0x447   :  { %1177 = vsyncpa [#allocation11], 1 }

</bundles_post_ra>
